<compile_context>
chip_gen: v7x
topology: tpu7x:2x2x1
jax: 0.10.0
libtpu: 0.0.40
codegen_flags: <defaults>
</compile_context>

<pallas_src>
import jax
import jax.numpy as jnp
from jax.experimental import pallas as pl
from jax.experimental.pallas import tpu as pltpu


# -----------------------------------------------------------------------------
# Kernel 1: global max-pool over the point axis (2-D lane reduction).
# -----------------------------------------------------------------------------
def _global_maxpool_kernel(src_ref, tgt_ref, ps_ref, pt_ref):
    ps_ref[...] = jnp.max(src_ref[...], axis=-1, keepdims=True)
    pt_ref[...] = jnp.max(tgt_ref[...], axis=-1, keepdims=True)


# -----------------------------------------------------------------------------
# Kernel 2: fused MLP head (folded BN) + projection heads + quat normalise +
# quat2mat, one batch chunk per grid step.
# -----------------------------------------------------------------------------
def _mlp_head_kernel(ps_ref, pt_ref,
                     w1a_ref, w1b_ref, b1_ref,
                     w2_ref, b2_ref,
                     w3_ref, b3_ref,
                     wr_ref, br_ref,
                     wt_ref, bt_ref,
                     rot_ref, trans_ref):
    f32 = jnp.float32
    s = ps_ref[...].astype(f32)                       # (b, E)  pooled src
    t = pt_ref[...].astype(f32)                       # (b, E)  pooled tgt

    # Linear(2E -> E/2) with eval-mode BN folded; the channel concat is
    # realised as two matmuls against the two halves of W1.
    h = jnp.dot(s, w1a_ref[...], preferred_element_type=f32)
    h = h + jnp.dot(t, w1b_ref[...], preferred_element_type=f32)
    h = jnp.maximum(h + b1_ref[...], 0.0)

    # Linear(E/2 -> E/4) + folded BN + ReLU.
    h = jnp.maximum(
        jnp.dot(h, w2_ref[...], preferred_element_type=f32) + b2_ref[...], 0.0)
    # Linear(E/4 -> E/8) + folded BN + ReLU.
    h = jnp.maximum(
        jnp.dot(h, w3_ref[...], preferred_element_type=f32) + b3_ref[...], 0.0)

    # Projection heads.
    q = jnp.dot(h, wr_ref[...], preferred_element_type=f32) + br_ref[...]   # (b, 4)
    tr = jnp.dot(h, wt_ref[...], preferred_element_type=f32) + bt_ref[...]  # (b, 3)

    # rotation / ||rotation||_2  (L2-normalise the quaternion).
    q = q * jax.lax.rsqrt(jnp.sum(q * q, axis=-1, keepdims=True))

    # quat2mat with quat = [x, y, z, w] (DCP/PRNet convention).
    qx, qy, qz, qw = q[:, 0:1], q[:, 1:2], q[:, 2:3], q[:, 3:4]
    x2, y2, z2, w2 = qx * qx, qy * qy, qz * qz, qw * qw
    wx, wy, wz = qw * qx, qw * qy, qw * qz
    xy, xz, yz = qx * qy, qx * qz, qy * qz
    terms = (w2 + x2 - y2 - z2, 2.0 * xy - 2.0 * wz, 2.0 * wy + 2.0 * xz,
             2.0 * wz + 2.0 * xy, w2 - x2 + y2 - z2, 2.0 * yz - 2.0 * wx,
             2.0 * xz - 2.0 * wy, 2.0 * wx + 2.0 * yz, w2 - x2 - y2 + z2)

    nb = rot_ref.shape[0]
    lane = jax.lax.broadcasted_iota(jnp.int32, (nb, 9), 1)
    r9 = jnp.zeros((nb, 9), f32)
    for i, term in enumerate(terms):          # lane-packed build, single store
        r9 = jnp.where(lane == i, term, r9)

    rot_ref[...] = r9.astype(rot_ref.dtype)
    trans_ref[...] = tr.astype(trans_ref.dtype)


# -----------------------------------------------------------------------------
# Wrapper glue.
# -----------------------------------------------------------------------------
def _fold_bn_into_linear(w, b, gamma, beta, mean, var, eps):
    """Fold eval-mode BatchNorm1d into the preceding Linear (y = x W^T + b)."""
    s = gamma * jax.lax.rsqrt(var.astype(jnp.float32) + eps)
    return w * s[:, None], (b - mean) * s + beta


def _row_block(rows, ncols, target_bytes=2 << 20):
    """Largest row block (multiple of 8, dividing `rows`) within a VMEM target.

    2 MiB per block keeps 2 inputs x 2 pipeline buffers <= 8 MiB, well inside
    the smallest scoped-VMEM default (16 MiB on v5e).
    """
    if rows * ncols * 4 <= target_bytes or rows % 8 != 0:
        return rows
    blk = min(rows, max(8, (target_bytes // (ncols * 4)) // 8 * 8))
    while rows % blk:
        blk -= 8
    return max(blk, 8)


def _batch_block(batch):
    """Whole batch per step when small; else a multiple-of-8 divisor <= 256."""
    if batch <= 256:
        return batch
    for cand in range(256, 7, -8):
        if batch % cand == 0:
            return cand
    return batch


def mlp_head_forward(src_embedding, tgt_embedding, params, eps=1e-5):
    """Pallas implementation of MLPHead.forward (eval-mode BN).

    src_embedding, tgt_embedding: (B, E, N) float32 with E = args.emb_dims.
    Returns (rotation (B, 3, 3), translation (B, 3)).
    """
    f32 = jnp.float32
    bsz, emb, npts = src_embedding.shape
    assert tgt_embedding.shape == (bsz, emb, npts)
    h1, h2, h3 = emb // 2, emb // 4, emb // 8

    # ---------------- Stage 1: global max-pool over the point axis ----------
    rows = bsz * emb
    src2d = src_embedding.reshape(rows, npts).astype(f32)   # free reshape (NCL contiguous)
    tgt2d = tgt_embedding.reshape(rows, npts).astype(f32)
    rblk = _row_block(rows, npts)

    ps2d, pt2d = pl.pallas_call(
        _global_maxpool_kernel,
        out_shape=(jax.ShapeDtypeStruct((rows, 1), f32),
                   jax.ShapeDtypeStruct((rows, 1), f32)),
        grid_spec=pltpu.PrefetchScalarGridSpec(
            num_scalar_prefetch=0,
            grid=(rows // rblk,),
            in_specs=[
                pl.BlockSpec((rblk, npts), lambda i: (i, 0)),
                pl.BlockSpec((rblk, npts), lambda i: (i, 0)),
            ],
            out_specs=[
                pl.BlockSpec((rblk, 1), lambda i: (i, 0)),
                pl.BlockSpec((rblk, 1), lambda i: (i, 0)),
            ],
        ),
        compiler_params=pltpu.CompilerParams(
            dimension_semantics=("parallel",)),
    )(src2d, tgt2d)

    pooled_src = ps2d.reshape(bsz, emb)     # (B, E) -- free reshape
    pooled_tgt = pt2d.reshape(bsz, emb)

    # ---------------- Stage 2: fold BN, pre-transpose weights ---------------
    w1f, b1f = _fold_bn_into_linear(params["w1"], params["b1"],
                                    params["bn1_gamma"], params["bn1_beta"],
                                    params["bn1_mean"], params["bn1_var"], eps)
    w2f, b2f = _fold_bn_into_linear(params["w2"], params["b2"],
                                    params["bn2_gamma"], params["bn2_beta"],
                                    params["bn2_mean"], params["bn2_var"], eps)
    w3f, b3f = _fold_bn_into_linear(params["w3"], params["b3"],
                                    params["bn3_gamma"], params["bn3_beta"],
                                    params["bn3_mean"], params["bn3_var"], eps)

    w1t = w1f.T.astype(f32)                      # (2E, H1)
    w1a, w1b = w1t[:emb], w1t[emb:]              # (E, H1) each
    w2t = w2f.T.astype(f32)                      # (H1, H2)
    w3t = w3f.T.astype(f32)                      # (H2, H3)
    wrt = params["wr"].T.astype(f32)             # (H3, 4)
    wtt = params["wt"].T.astype(f32)             # (H3, 3)
    b1r = b1f.reshape(1, h1).astype(f32)
    b2r = b2f.reshape(1, h2).astype(f32)
    b3r = b3f.reshape(1, h3).astype(f32)
    brr = params["br"].reshape(1, 4).astype(f32)
    btr = params["bt"].reshape(1, 3).astype(f32)

    # ---------------- Stage 3: fused MLP head kernel -------------------------
    bblk = _batch_block(bsz)
    const2d = lambda i: (0, 0)

    rot9, trans = pl.pallas_call(
        _mlp_head_kernel,
        out_shape=(jax.ShapeDtypeStruct((bsz, 9), f32),
                   jax.ShapeDtypeStruct((bsz, 3), f32)),
        grid_spec=pltpu.PrefetchScalarGridSpec(
            num_scalar_prefetch=0,
            grid=(bsz // bblk,),
            in_specs=[
                pl.BlockSpec((bblk, emb), lambda i: (i, 0)),   # pooled src
                pl.BlockSpec((bblk, emb), lambda i: (i, 0)),   # pooled tgt
                pl.BlockSpec((emb, h1), const2d),              # W1[:E]  (BN folded, transposed)
                pl.BlockSpec((emb, h1), const2d),              # W1[E:]  (BN folded, transposed)
                pl.BlockSpec((1, h1), const2d),                # b1 (BN folded)
                pl.BlockSpec((h1, h2), const2d),               # W2
                pl.BlockSpec((1, h2), const2d),                # b2
                pl.BlockSpec((h2, h3), const2d),               # W3
                pl.BlockSpec((1, h3), const2d),                # b3
                pl.BlockSpec((h3, 4), const2d),                # W_rot
                pl.BlockSpec((1, 4), const2d),                 # b_rot
                pl.BlockSpec((h3, 3), const2d),                # W_trans
                pl.BlockSpec((1, 3), const2d),                 # b_trans
            ],
            out_specs=[
                pl.BlockSpec((bblk, 9), lambda i: (i, 0)),
                pl.BlockSpec((bblk, 3), lambda i: (i, 0)),
            ],
        ),
        compiler_params=pltpu.CompilerParams(
            dimension_semantics=("parallel",)),
    )(pooled_src, pooled_tgt,
      w1a, w1b, b1r, w2t, b2r, w3t, b3r, wrt, brr, wtt, btr)

    return rot9.reshape(bsz, 3, 3), trans


# -----------------------------------------------------------------------------
# Pure-JAX reference (mirrors the PyTorch forward, eval-mode BN).
# -----------------------------------------------------------------------------
def _quat2mat_ref(q):
    x, y, z, w = q[:, 0], q[:, 1], q[:, 2], q[:, 3]
    w2, x2, y2, z2 = w * w, x * x, y * y, z * z
    wx, wy, wz = w * x, w * y, w * z
    xy, xz, yz = x * y, x * z, y * z
    rot = jnp.stack(
        [w2 + x2 - y2 - z2, 2 * xy - 2 * wz, 2 * wy + 2 * xz,
         2 * wz + 2 * xy, w2 - x2 + y2 - z2, 2 * yz - 2 * wx,
         2 * xz - 2 * wy, 2 * wx + 2 * yz, w2 - x2 - y2 + z2], axis=1)
    return rot.reshape(-1, 3, 3)


def _reference(src_embedding, tgt_embedding, params, eps=1e-5):
    x = jnp.max(jnp.concatenate([src_embedding, tgt_embedding], axis=1), axis=-1)

    def lin_bn_relu(inp, w, b, g, bt, m, v):
        y = inp @ w.T + b
        y = (y - m) * jax.lax.rsqrt(v + eps) * g + bt
        return jnp.maximum(y, 0.0)

    x = lin_bn_relu(x, params["w1"], params["b1"], params["bn1_gamma"],
                    params["bn1_beta"], params["bn1_mean"], params["bn1_var"])
    x = lin_bn_relu(x, params["w2"], params["b2"], params["bn2_gamma"],
                    params["bn2_beta"], params["bn2_mean"], params["bn2_var"])
    x = lin_bn_relu(x, params["w3"], params["b3"], params["bn3_gamma"],
                    params["bn3_beta"], params["bn3_mean"], params["bn3_var"])
    rot = x @ params["wr"].T + params["br"]
    rot = rot / jnp.linalg.norm(rot, axis=1, keepdims=True)
    trans = x @ params["wt"].T + params["bt"]
    return _quat2mat_ref(rot), trans


if __name__ == "__main__":
    # Small shapes: args.emb_dims = 32 -> Linear 64->16->8->4, heads 4->4 / 4->3.
    B, E, N = 2, 32, 16
    H1, H2, H3 = E // 2, E // 4, E // 8

    keys = iter(jax.random.split(jax.random.PRNGKey(0), 32))

    def nrm(shape, scale=0.2):
        return scale * jax.random.normal(next(keys), shape, dtype=jnp.float32)

    def bn_params(c):
        return (1.0 + 0.1 * jax.random.normal(next(keys), (c,), dtype=jnp.float32),
                0.1 * jax.random.normal(next(keys), (c,), dtype=jnp.float32),
                0.05 * jax.random.normal(next(keys), (c,), dtype=jnp.float32),
                1.0 + 0.1 * jax.random.uniform(next(keys), (c,), dtype=jnp.float32))

    g1, be1, m1, v1 = bn_params(H1)
    g2, be2, m2, v2 = bn_params(H2)
    g3, be3, m3, v3 = bn_params(H3)
    params = {
        "w1": nrm((H1, 2 * E)), "b1": nrm((H1,)),
        "bn1_gamma": g1, "bn1_beta": be1, "bn1_mean": m1, "bn1_var": v1,
        "w2": nrm((H2, H1)), "b2": nrm((H2,)),
        "bn2_gamma": g2, "bn2_beta": be2, "bn2_mean": m2, "bn2_var": v2,
        "w3": nrm((H3, H2)), "b3": nrm((H3,)),
        "bn3_gamma": g3, "bn3_beta": be3, "bn3_mean": m3, "bn3_var": v3,
        "wr": nrm((4, H3)), "br": nrm((4,)),
        "wt": nrm((3, H3)), "bt": nrm((3,)),
    }

    src_embedding = jax.random.normal(next(keys), (B, E, N), dtype=jnp.float32)
    tgt_embedding = jax.random.normal(next(keys), (B, E, N), dtype=jnp.float32)

    rot, trans = mlp_head_forward(src_embedding, tgt_embedding, params)
    rot, trans = jax.block_until_ready((rot, trans))

    ref_rot, ref_trans = _reference(src_embedding, tgt_embedding, params)
    assert rot.shape == (B, 3, 3) and trans.shape == (B, 3)
    assert jnp.allclose(rot, ref_rot, atol=1e-4, rtol=1e-4), "rotation mismatch"
    assert jnp.allclose(trans, ref_trans, atol=1e-4, rtol=1e-4), "translation mismatch"

    print("KERNEL_OK")
</pallas_src>

<mosaic_0001>
module attributes {stable_mosaic.version = 11 : i64} {
  func.func @_global_maxpool_kernel(%arg0: i32, %arg1: memref<64x16xf32, #tpu.memory_space<vmem>>, %arg2: memref<64x16xf32, #tpu.memory_space<vmem>>, %arg3: memref<64x1xf32, #tpu.memory_space<vmem>>, %arg4: memref<64x1xf32, #tpu.memory_space<vmem>>) attributes {dimension_semantics = [#tpu.dimension_semantics<parallel>], iteration_bounds = array<i64: 1>, scalar_prefetch = 0 : i64, scratch_operands = 0 : i64, tpu.core_type = #tpu.core_type<tc>, window_params = [{transform_indices = @transform_0, window_bounds = array<i64: 64, 16>}, {transform_indices = @transform_1, window_bounds = array<i64: 64, 16>}, {transform_indices = @transform_2, window_bounds = array<i64: 64, 1>}, {transform_indices = @transform_3, window_bounds = array<i64: 64, 1>}]} {
    %c0 = arith.constant 0 : index
    %c0_0 = arith.constant 0 : index
    %0 = vector.load %arg1[%c0, %c0_0] : memref<64x16xf32, #tpu.memory_space<vmem>>, vector<64x16xf32>
    %cst = arith.constant dense<0xFF800000> : vector<64xf32>
    %1 = vector.multi_reduction <maximumf>, %0, %cst [1] : vector<64x16xf32> to vector<64xf32>
    %2 = vector.shape_cast %1 : vector<64xf32> to vector<64x1xf32>
    %c0_1 = arith.constant 0 : index
    %c0_2 = arith.constant 0 : index
    %3 = vector.load %arg3[%c0_1, %c0_2] : memref<64x1xf32, #tpu.memory_space<vmem>>, vector<64x1xf32>
    tpu.vector_store %arg3[%c0_1, %c0_2], %2 {strides = array<i32>} : memref<64x1xf32, #tpu.memory_space<vmem>>, vector<64x1xf32>,
    %c0_3 = arith.constant 0 : index
    %c0_4 = arith.constant 0 : index
    %4 = vector.load %arg2[%c0_3, %c0_4] : memref<64x16xf32, #tpu.memory_space<vmem>>, vector<64x16xf32>
    %cst_5 = arith.constant dense<0xFF800000> : vector<64xf32>
    %5 = vector.multi_reduction <maximumf>, %4, %cst_5 [1] : vector<64x16xf32> to vector<64xf32>
    %6 = vector.shape_cast %5 : vector<64xf32> to vector<64x1xf32>
    %c0_6 = arith.constant 0 : index
    %c0_7 = arith.constant 0 : index
    %7 = vector.load %arg4[%c0_6, %c0_7] : memref<64x1xf32, #tpu.memory_space<vmem>>, vector<64x1xf32>
    tpu.vector_store %arg4[%c0_6, %c0_7], %6 {strides = array<i32>} : memref<64x1xf32, #tpu.memory_space<vmem>>, vector<64x1xf32>,
    return
  }
  func.func @transform_0(%arg0: i32) -> (i32, i32) {
    %c0_i32 = arith.constant 0 : i32
    %c0_i32_0 = arith.constant 0 : i32
    return %arg0, %c0_i32 : i32, i32
  }
  func.func @transform_1(%arg0: i32) -> (i32, i32) {
    %c0_i32 = arith.constant 0 : i32
    %c0_i32_0 = arith.constant 0 : i32
    return %arg0, %c0_i32 : i32, i32
  }
  func.func @transform_2(%arg0: i32) -> (i32, i32) {
    %c0_i32 = arith.constant 0 : i32
    %c0_i32_0 = arith.constant 0 : i32
    return %arg0, %c0_i32 : i32, i32
  }
  func.func @transform_3(%arg0: i32) -> (i32, i32) {
    %c0_i32 = arith.constant 0 : i32
    %c0_i32_0 = arith.constant 0 : i32
    return %arg0, %c0_i32 : i32, i32
  }
}

</mosaic_0001>

<bundles_post_ra>
// kernel: tpu_custom_call.1
= control target key start
LH: loop header
LB: loop body
LE: loop exit
PB: predicated region body
PF: predicated region fallthrough
CT: control target
= control target key end

     0   :  { %vm21_vm0 = vcmask 130048   ;;  %vm46_vm1 = vcmask 7168   ;;  %s251_s0 = inlined_call_operand.vmem [shape: f32[64,16], index: 0, kind: input, shape index: {}]   ;;  %s252_s1 = inlined_call_operand.vmem [shape: f32[64,16], index: 1, kind: input, shape index: {}]   ;;  %s253_s2 = inlined_call_operand.vmem [shape: f32[64,1], index: 2, kind: output, shape index: {0}]   ;;  %s254_s3 = inlined_call_operand.vmem [shape: f32[64,1], index: 3, kind: output, shape index: {1}]  }
   0x1   :  { %v15_v0 = vld [vmem:[%s251_s0 + $0x10] sm:$0xff]  ;;  %v13_v1 = vld [vmem:[%s251_s0] sm:$0xff]  ;;  %v16_v2 = vld [vmem:[%s251_s0 + $0x18] sm:$0xff] }
   0x2   :  { %v28_v3 = vsel %vm21_vm0, %v15_v0, -inf  ;;  %v22_v4 = vsel %vm21_vm0, %v13_v1, -inf  ;;  %v14_v5 = vld [vmem:[%s251_s0 + $0x8] sm:$0xff]  ;;  %v31_v6 = vsel %vm21_vm0, %v16_v2, -inf  ;;  %v17_v9 = vld [vmem:[%s251_s0 + $0x20] sm:$0xff]  ;;  %v20_v12 = vld [vmem:[%s251_s0 + $0x38] sm:$0xff] }
   0x3   :  { %29 = vmax.xlane.f32.xlu1 %v28_v3  ;;  %23 = vmax.xlane.f32.xlu0 %v22_v4  ;;  %v25_v7 = vsel %vm21_vm0, %v14_v5, -inf  ;;  %v18_v8 = vld [vmem:[%s251_s0 + $0x28] sm:$0xff]  ;;  %v34_v11 = vsel %vm21_vm0, %v17_v9, -inf  ;;  %v19_v13 = vld [vmem:[%s251_s0 + $0x30] sm:$0xff]  ;;  %v43_v14 = vsel %vm21_vm0, %v20_v12, -inf  ;;  %v55_v17 = vld [vmem:[%s252_s1] sm:$0xff] }
   0x4   :  { %v37_v10 = vsel %vm21_vm0, %v18_v8, -inf  ;;  %v40_v15 = vsel %vm21_vm0, %v19_v13, -inf  ;;  %v56_v16 = vld [vmem:[%s252_s1 + $0x8] sm:$0xff]  ;;  %v63_v19 = vsel %vm21_vm0, %v55_v17, -inf  ;;  %v58_v20 = vld [vmem:[%s252_s1 + $0x18] sm:$0xff]  ;;  %v57_v21 = vld [vmem:[%s252_s1 + $0x10] sm:$0xff] }
   0x5   :  { %v66_v18 = vsel %vm21_vm0, %v56_v16, -inf  ;;  %v72_v22 = vsel %vm21_vm0, %v58_v20, -inf  ;;  %v69_v23 = vsel %vm21_vm0, %v57_v21, -inf  ;;  %v60_v24 = vld [vmem:[%s252_s1 + $0x28] sm:$0xff]  ;;  %v59_v25 = vld [vmem:[%s252_s1 + $0x20] sm:$0xff]  ;;  %v62_v28 = vld [vmem:[%s252_s1 + $0x38] sm:$0xff] }
   0x6   :  { %v78_v26 = vsel %vm21_vm0, %v60_v24, -inf  ;;  %v75_v27 = vsel %vm21_vm0, %v59_v25, -inf  ;;  %v61_v29 = vld [vmem:[%s252_s1 + $0x30] sm:$0xff]  ;;  %v84_v30 = vsel %vm21_vm0, %v62_v28, -inf }
   0x7   :  { %32 = vmax.xlane.f32.xlu1 %v31_v6  ;;  %26 = vmax.xlane.f32.xlu0 %v25_v7  ;;  %v81_v31 = vsel %vm21_vm0, %v61_v29, -inf }
   0xb   :  { %38 = vmax.xlane.f32.xlu1 %v37_v10  ;;  %35 = vmax.xlane.f32.xlu0 %v34_v11 }
   0xf   :  { %44 = vmax.xlane.f32.xlu1 %v43_v14  ;;  %41 = vmax.xlane.f32.xlu0 %v40_v15 }
  0x13   :  { %67 = vmax.xlane.f32.xlu1 %v66_v18  ;;  %64 = vmax.xlane.f32.xlu0 %v63_v19 }
  0x17   :  { %73 = vmax.xlane.f32.xlu1 %v72_v22  ;;  %70 = vmax.xlane.f32.xlu0 %v69_v23 }
  0x1b   :  { %79 = vmax.xlane.f32.xlu1 %v78_v26  ;;  %76 = vmax.xlane.f32.xlu0 %v75_v27 }
  0x1f   :  { %85 = vmax.xlane.f32.xlu1 %v84_v30  ;;  %82 = vmax.xlane.f32.xlu0 %v81_v31 }
  0x90   :  { %v30_v32 = vpop.xlane.xlu1 %29  ;;  %v24_v33 = vpop.xlane.xlu0 %23 }
  0x91   :  { %49 = vst.msk [vmem:[%s253_s2 + $0x10] sm:$0xff] %vm46_vm1, %v30_v32  ;;  %47 = vst.msk [vmem:[%s253_s2] sm:$0xff] %vm46_vm1, %v24_v33 }
  0x94   :  { %v33_v34 = vpop.xlane.xlu1 %32  ;;  %v27_v35 = vpop.xlane.xlu0 %26 }
  0x95   :  { %50 = vst.msk [vmem:[%s253_s2 + $0x18] sm:$0xff] %vm46_vm1, %v33_v34  ;;  %48 = vst.msk [vmem:[%s253_s2 + $0x8] sm:$0xff] %vm46_vm1, %v27_v35 }
  0x98   :  { %v39_v36 = vpop.xlane.xlu1 %38  ;;  %v36_v37 = vpop.xlane.xlu0 %35 }
  0x99   :  { %52 = vst.msk [vmem:[%s253_s2 + $0x28] sm:$0xff] %vm46_vm1, %v39_v36  ;;  %51 = vst.msk [vmem:[%s253_s2 + $0x20] sm:$0xff] %vm46_vm1, %v36_v37 }
  0x9c   :  { %v45_v38 = vpop.xlane.xlu1 %44  ;;  %v42_v39 = vpop.xlane.xlu0 %41 }
  0x9d   :  { %54 = vst.msk [vmem:[%s253_s2 + $0x38] sm:$0xff] %vm46_vm1, %v45_v38  ;;  %53 = vst.msk [vmem:[%s253_s2 + $0x30] sm:$0xff] %vm46_vm1, %v42_v39 }
  0xa0   :  { %v68_v40 = vpop.xlane.xlu1 %67  ;;  %v65_v41 = vpop.xlane.xlu0 %64 }
  0xa1   :  { %88 = vst.msk [vmem:[%s254_s3 + $0x8] sm:$0xff] %vm46_vm1, %v68_v40  ;;  %87 = vst.msk [vmem:[%s254_s3] sm:$0xff] %vm46_vm1, %v65_v41 }
  0xa4   :  { %v74_v42 = vpop.xlane.xlu1 %73  ;;  %v71_v43 = vpop.xlane.xlu0 %70 }
  0xa5   :  { %90 = vst.msk [vmem:[%s254_s3 + $0x18] sm:$0xff] %vm46_vm1, %v74_v42  ;;  %89 = vst.msk [vmem:[%s254_s3 + $0x10] sm:$0xff] %vm46_vm1, %v71_v43 }
  0xa8   :  { %v80_v44 = vpop.xlane.xlu1 %79  ;;  %v77_v45 = vpop.xlane.xlu0 %76 }
  0xa9   :  { %92 = vst.msk [vmem:[%s254_s3 + $0x28] sm:$0xff] %vm46_vm1, %v80_v44  ;;  %91 = vst.msk [vmem:[%s254_s3 + $0x20] sm:$0xff] %vm46_vm1, %v77_v45 }
  0xac   :  { %v86_v46 = vpop.xlane.xlu1 %85  ;;  %v83_v47 = vpop.xlane.xlu0 %82 }
  0xad   :  { %94 = vst.msk [vmem:[%s254_s3 + $0x38] sm:$0xff] %vm46_vm1, %v86_v46  ;;  %93 = vst.msk [vmem:[%s254_s3 + $0x30] sm:$0xff] %vm46_vm1, %v83_v47 }

</bundles_post_ra>
